<compile_context>
chip_gen: v7x
topology: tpu7x:2x2x1
jax: 0.10.0
libtpu: 0.0.40
codegen_flags: <defaults>
</compile_context>

<pallas_src>
import math

import numpy as np

import jax
import jax.numpy as jnp
from jax.experimental import pallas as pl
from jax.experimental.pallas import tpu as pltpu

_PI_F32 = float(np.float32(math.pi))            # float32(pi), matches torch's rounding
_HALF_PI_F32 = float(np.float32(math.pi / 2.0))


def _vmem_budgets():
    """Generation-aware (tile working-set budget, declared vmem limit) in bytes."""
    try:
        info = pltpu.get_tpu_info()
        cap = int(getattr(info, "vmem_capacity_bytes", 64 * 1024 * 1024))
    except Exception:
        cap = 64 * 1024 * 1024                  # assume the smallest (v7x) if unknown
    limit = int(cap * 0.75)                     # 48 MiB on v7x, 96 MiB on v5e/v6e
    budget = int(cap * 0.55)                    # 35 MiB on v7x, 70 MiB on v5e/v6e
    return budget, limit


def _make_kernel(two_l: int):
    def kernel(x_ref, fpi_ref, ph_ref, out_ref):
        # x_ref:   (tb, Dp)   input rows (row-folded and/or feature-padded)
        # fpi_ref: (1, Wp)    per-output-column  2^i * pi   (pi folded host-side)
        # ph_ref:  (1, Wp)    per-output-column phase: 0 (sin half) / pi/2 (cos half)
        # out_ref: (tb, Wp)   lane-dense output slab; one unmasked full-width store
        tb, dp = x_ref.shape
        # Exact per-feature replication: (tb, Dp) -> (tb, Dp, 2L) -> (tb, Wp).
        # (Deliberately not an MXU 0/1 expansion matmul: f32 MXU matmuls are
        #  bf16-pass emulated, which would not be a bit-exact pass-through.)
        x_wide = jnp.broadcast_to(x_ref[...][:, :, None], (tb, dp, two_l))
        x_wide = x_wide.reshape(tb, dp * two_l)
        # Single lane-dense elementwise pass: sin(x * 2^i*pi + {0, pi/2}).
        out_ref[...] = jnp.sin(x_wide * fpi_ref[...] + ph_ref[...])

    return kernel


def positional_embedding(x, L):
    """NeRF-style positional embedding. x: (B, D) f32 -> (B, D*2L) f32."""
    B, D = x.shape
    two_l = 2 * L
    W = D * two_l

    # --- Row folding: (B, W) row-major == (B//k, k*W) row-major, and the op is
    # purely per-scalar, so folding k rows is a free view on input and output.
    k = 1
    if W % 128 != 0:
        need = 128 // math.gcd(W, 128)
        if B % need == 0:
            k = need
    Bf, Df = B // k, D * k
    Wf = Df * two_l                              # == W * k

    # --- Pad fallback: if folding could not make the output lane-dense, pad the
    # (folded) feature dim so the output slab width is a multiple of 128.
    if Wf % 128 != 0:
        need_d = 128 // math.gcd(two_l, 128)
        Dp = ((Df + need_d - 1) // need_d) * need_d
    else:
        Dp = Df
    Wp = Dp * two_l

    xf = x.reshape(Bf, Df)
    if Dp != Df:
        xf = jnp.pad(xf, ((0, 0), (0, Dp - Df)))

    # --- Host-side per-column frequency (2^i * float32(pi), exact) and phase rows.
    m = np.arange(Wp) % two_l
    i = np.where(m < L, m, m - L)
    fpi_row = jnp.asarray(((2.0 ** i) * _PI_F32).astype(np.float32).reshape(1, Wp))
    ph_row = jnp.asarray(
        np.where(m < L, np.float32(0.0), np.float32(_HALF_PI_F32)).astype(np.float32)
        .reshape(1, Wp))

    # --- Row-tile size: account for double-buffered in/out tiles AND in-kernel
    # temporaries (the (tb, Dp, 2L) broadcast intermediate is lane-padded to 128).
    budget, vmem_limit = _vmem_budgets()
    pad3d_row = ((Dp + 7) // 8 * 8) * 128 * 4            # lane-padded broadcast temp
    bytes_per_row = 4 * (2 * Dp + 4 * Wp) + pad3d_row    # 2x in, 2x out, ~2 temps
    fixed = 2 * 4 * (2 * Wp)                             # fpi/ph rows (double-buffered)
    tb = max((budget - fixed) // bytes_per_row, 8)       # floor of 8 rows (may exceed
    tb = (tb // 8) * 8                                   # budget only for huge Wp)
    if tb >= Bf:
        tb = Bf
    else:
        # Prefer a tile that divides Bf (no masked remainder tile); else keep cap.
        for cand in range(tb, 7, -8):
            if Bf % cand == 0:
                tb = cand
                break
    grid = (pl.cdiv(Bf, tb),)

    cost = pl.CostEstimate(
        flops=2 * Bf * Wp,
        transcendentals=Bf * Wp,
        bytes_accessed=4 * (Bf * Dp + Bf * Wp + 2 * Wp),
    )

    out = pl.pallas_call(
        _make_kernel(two_l),
        out_shape=jax.ShapeDtypeStruct((Bf, Wp), jnp.float32),
        grid_spec=pl.GridSpec(
            grid=grid,
            in_specs=[
                pl.BlockSpec((tb, Dp), lambda r: (r, 0)),
                pl.BlockSpec((1, Wp), lambda r: (0, 0)),
                pl.BlockSpec((1, Wp), lambda r: (0, 0)),
            ],
            out_specs=pl.BlockSpec((tb, Wp), lambda r: (r, 0)),
        ),
        compiler_params=pltpu.CompilerParams(
            dimension_semantics=("parallel",),
            vmem_limit_bytes=vmem_limit,
        ),
        cost_estimate=cost,
    )(xf, fpi_row, ph_row)

    if Dp != Df:
        out = out[:, :Wf]          # drop pad columns (copy; only on the pad path)
    return out.reshape(B, W)       # pure row-major view on the fold / aligned paths


def _reference(x, L):
    # Mirrors the torch evaluation order: (x * 2^i) * pi, then cat(sin, cos).
    freqs = jnp.asarray([float(2.0 ** i) for i in range(L)], dtype=jnp.float32)
    x_scaled = x[..., None] * freqs * _PI_F32
    emb = jnp.concatenate([jnp.sin(x_scaled), jnp.cos(x_scaled)], axis=-1)
    return emb.reshape(x.shape[0], -1)


if __name__ == "__main__":
    key0, key1 = jax.random.split(jax.random.PRNGKey(0))
    L = 8
    emb_fn = jax.jit(positional_embedding, static_argnums=1)

    # Fold path: B=16, D=4 -> W=64, folds 2 rows -> lane-dense 128-wide slab.
    B, D = 16, 4
    x = jax.random.uniform(key0, (B, D), dtype=jnp.float32, minval=-1.0, maxval=1.0)
    out = jax.block_until_ready(emb_fn(x, L))
    ref = _reference(x, L)
    assert out.shape == (B, D * 2 * L)
    # cos computed as sin(arg + pi/2): <= ~0.5 ulp of the argument -> 5e-4 abs tol.
    assert float(jnp.max(jnp.abs(out - ref))) < 5e-4, "mismatch vs reference (fold path)"

    # Pad-to-128 fallback path: B=6, D=3 -> W=48, B not divisible by fold factor.
    B2, D2 = 6, 3
    x2 = jax.random.uniform(key1, (B2, D2), dtype=jnp.float32, minval=-1.0, maxval=1.0)
    out2 = jax.block_until_ready(emb_fn(x2, L))
    ref2 = _reference(x2, L)
    assert out2.shape == (B2, D2 * 2 * L)
    assert float(jnp.max(jnp.abs(out2 - ref2))) < 5e-4, "mismatch vs reference (pad path)"

    print("KERNEL_OK")
</pallas_src>

<mosaic_0001>
module attributes {stable_mosaic.version = 11 : i64} {
  func.func @kernel(%arg0: i32, %arg1: memref<8x8xf32, #tpu.memory_space<vmem>>, %arg2: memref<1x128xf32, #tpu.memory_space<vmem>>, %arg3: memref<1x128xf32, #tpu.memory_space<vmem>>, %arg4: memref<8x128xf32, #tpu.memory_space<vmem>>) attributes {dimension_semantics = [#tpu.dimension_semantics<parallel>], iteration_bounds = array<i64: 1>, scalar_prefetch = 0 : i64, scratch_operands = 0 : i64, tpu.core_type = #tpu.core_type<tc>, window_params = [{transform_indices = @transform_0, window_bounds = array<i64: 8, 8>}, {pipeline_mode = #tpu.pipeline_mode<synchronous>, transform_indices = @transform_1, window_bounds = array<i64: 1, 128>}, {pipeline_mode = #tpu.pipeline_mode<synchronous>, transform_indices = @transform_2, window_bounds = array<i64: 1, 128>}, {transform_indices = @transform_3, window_bounds = array<i64: 8, 128>}]} {
    %c0 = arith.constant 0 : index
    %c0_0 = arith.constant 0 : index
    %0 = vector.load %arg1[%c0, %c0_0] : memref<8x8xf32, #tpu.memory_space<vmem>>, vector<8x8xf32>
    %1 = vector.shape_cast %0 : vector<8x8xf32> to vector<8x8x1xf32>
    %2 = vector.shape_cast %1 : vector<8x8x1xf32> to vector<8x8x1xf32>
    %3 = vector.broadcast %2 : vector<8x8x1xf32> to vector<8x8x16xf32>
    %4 = vector.shape_cast %3 : vector<8x8x16xf32> to vector<8x128xf32>
    %c0_1 = arith.constant 0 : index
    %c0_2 = arith.constant 0 : index
    %5 = vector.load %arg2[%c0_1, %c0_2] : memref<1x128xf32, #tpu.memory_space<vmem>>, vector<1x128xf32>
    %6 = vector.broadcast %5 : vector<1x128xf32> to vector<8x128xf32>
    %7 = arith.mulf %4, %6 : vector<8x128xf32>
    %c0_3 = arith.constant 0 : index
    %c0_4 = arith.constant 0 : index
    %8 = vector.load %arg3[%c0_3, %c0_4] : memref<1x128xf32, #tpu.memory_space<vmem>>, vector<1x128xf32>
    %9 = vector.broadcast %8 : vector<1x128xf32> to vector<8x128xf32>
    %10 = arith.addf %7, %9 : vector<8x128xf32>
    %11 = math.sin %10 : vector<8x128xf32>
    %c0_5 = arith.constant 0 : index
    %c0_6 = arith.constant 0 : index
    %12 = vector.load %arg4[%c0_5, %c0_6] : memref<8x128xf32, #tpu.memory_space<vmem>>, vector<8x128xf32>
    tpu.vector_store %arg4[%c0_5, %c0_6], %11 {strides = array<i32>} : memref<8x128xf32, #tpu.memory_space<vmem>>, vector<8x128xf32>,
    return
  }
  func.func @transform_0(%arg0: i32) -> (i32, i32) {
    %c0_i32 = arith.constant 0 : i32
    %c0_i32_0 = arith.constant 0 : i32
    return %arg0, %c0_i32 : i32, i32
  }
  func.func @transform_1(%arg0: i32) -> (i32, i32) {
    %c0_i32 = arith.constant 0 : i32
    %c0_i32_0 = arith.constant 0 : i32
    %c0_i32_1 = arith.constant 0 : i32
    return %c0_i32, %c0_i32_0 : i32, i32
  }
  func.func @transform_2(%arg0: i32) -> (i32, i32) {
    %c0_i32 = arith.constant 0 : i32
    %c0_i32_0 = arith.constant 0 : i32
    %c0_i32_1 = arith.constant 0 : i32
    return %c0_i32, %c0_i32_0 : i32, i32
  }
  func.func @transform_3(%arg0: i32) -> (i32, i32) {
    %c0_i32 = arith.constant 0 : i32
    %c0_i32_0 = arith.constant 0 : i32
    return %arg0, %c0_i32 : i32, i32
  }
}

</mosaic_0001>

<bundles_post_ra>
// kernel: positional_embedding.1
= control target key start
LH: loop header
LB: loop body
LE: loop exit
PB: predicated region body
PF: predicated region fallthrough
CT: control target
= control target key end

     0   :  { %v15_v0 = vlaneseq  ;;  %v403_v20 = vmov 1983009808   ;;  %v404_v27 = vmov 1934713408   ;;  %s406_s14 = smov 16   ;;  %s407_s15 = smov 64   ;;  %s471_s0 = inlined_call_operand.vmem [shape: f32[8,8], index: 0, kind: input, shape index: {}]   ;;  %s472_s1 = inlined_call_operand.vmem [shape: f32[1,128], index: 1, kind: input, shape index: {}]   ;;  %s473_s2 = inlined_call_operand.vmem [shape: f32[1,128], index: 2, kind: input, shape index: {}]   ;;  %s474_s3 = inlined_call_operand.vmem [shape: f32[8,128], index: 3, kind: output, shape index: {}]  }
   0x1   :  { %v14_v2 = vld [vmem:[%s471_s0] sm:$0xff]  ;;  %v74_v21 = vunpack.c.l.s4 %v403_v20  ;;  %v138_v28 = vunpack.c.l.s4 %v404_v27  ;;  %s405_s0 = smov 32   ;;  %s408_s16 = smov 48   ;;  %vm235_vm0 = vcmask 130048   ;;  %vm237_vm1 = vcmask 261120  }
   0x2   :  { %v16_v1 = vshrl.u32 %v15_v0, 7  ;;  %s409_s17 = smov 96   ;;  %s410_s18 = smov 80   ;;  %vm239_vm2 = vcmask 392192   ;;  %vm241_vm3 = vcmask 523264   ;;  %vm243_vm4 = vcmask 654336  }
   0x3   :  { %v75_v23 = vunpack.c.0.s8 %v74_v21  ;;  %v139_v35 = vunpack.c.0.s8 %v138_v28  ;;  %s411_s19 = smov 112   ;;  %vm245_vm5 = vcmask 785408   ;;  %vm247_vm6 = vcmask 916480  }
   0x4   :  { %v31_v3 = vsub.s32 2, %v16_v1  ;;  %v17_v4 = vsub.s32 0, %v16_v1  ;;  %v38_v5 = vsub.s32 3, %v16_v1  ;;  %v24_v6 = vsub.s32 1, %v16_v1 }
   0x5   :  { %v52_v11 = vsub.s32 5, %v16_v1  ;;  %v45_v12 = vsub.s32 4, %v16_v1  ;;  %v66_v15 = vsub.s32 7, %v16_v1  ;;  %v59_v16 = vsub.s32 6, %v16_v1 }
   0x6   :  { %v32_v7 = vrot.slane %v14_v2, %v31_v3  ;;  %v18_v8 = vrot.slane %v14_v2, %v17_v4  ;;  %v39_v9 = vrot.slane %v14_v2, %v38_v5  ;;  %v25_v10 = vrot.slane %v14_v2, %v24_v6 }
   0x7   :  { %v53_v13 = vrot.slane %v14_v2, %v52_v11  ;;  %v46_v14 = vrot.slane %v14_v2, %v45_v12  ;;  %v67_v17 = vrot.slane %v14_v2, %v66_v15  ;;  %v60_v18 = vrot.slane %v14_v2, %v59_v16 }
   0x8   :  { %34 = vbcast.lane.b32.xlu1 %v32_v7, 256  ;;  %20 = vbcast.lane.b32.xlu0 %v18_v8, 256  ;;  %v78_v29 = vsub.s32 %v75_v23, %v16_v1  ;;  %v142_v47 = vsub.s32 %v139_v35, %v16_v1 }
   0xc   :  { %41 = vbcast.lane.b32.xlu1 %v39_v9, 256  ;;  %27 = vbcast.lane.b32.xlu0 %v25_v10, 256 }
  0x10   :  { %55 = vbcast.lane.b32.xlu1 %v53_v13, 256  ;;  %48 = vbcast.lane.b32.xlu0 %v46_v14, 256 }
  0x14   :  { %69 = vbcast.lane.b32.xlu1 %v67_v17, 256  ;;  %62 = vbcast.lane.b32.xlu0 %v60_v18, 256 }
  0x7a   :  { %v35_v19 = vpop.permute.xlu1 %34  ;;  %v21_v22 = vpop.permute.xlu0 %20 }
  0x7b   :  { %v71_v30 = vcombine.low %v21_v22, %v35_v19  ;;  %v72_v36 = vcombine.high %v21_v22, %v35_v19  ;;  %v374_v22 = vld [vmem:[%s472_s1] ss:$0 sm:$0xff] }
  0x7d   :  { %v79_v37 = vrot.slane %v71_v30, %v78_v29  ;;  %v86_v52 = vrot.slane %v72_v36, %v78_v29 }
  0x7e   :  { %v42_v24 = vpop.permute.xlu1 %41  ;;  %v28_v25 = vpop.permute.xlu0 %27 }
  0x7f   :  { %v87_v26 = vcombine.low %v28_v25, %v42_v24  ;;  %v88_v33 = vcombine.high %v28_v25, %v42_v24  ;;  %v375_v25 = vld [vmem:[%s473_s2] ss:$0 sm:$0xff] }
  0x81   :  { %v95_v34 = vrot.slane %v87_v26, %v78_v29  ;;  %v102_v44 = vrot.slane %v88_v33, %v78_v29 }
  0x82   :  { %v56_v31 = vpop.permute.xlu1 %55  ;;  %v49_v32 = vpop.permute.xlu0 %48 }
  0x83   :  { %v135_v45 = vcombine.low %v79_v37, %v95_v34  ;;  %v136_v46 = vcombine.high %v79_v37, %v95_v34  ;;  %v151_v56 = vcombine.low %v86_v52, %v102_v44  ;;  %v152_v3 = vcombine.high %v86_v52, %v102_v44 }
  0x84   :  { %v414_v44 = vmov 2131351028  }
  0x85   :  { %v150_v57 = vrot.slane %v136_v46, %v142_v47  ;;  %v143_v59 = vrot.slane %v135_v45, %v142_v47  ;;  %v159_v1 = vrot.slane %v151_v56, %v142_v47  ;;  %v166_v7 = vrot.slane %v152_v3, %v142_v47 }
  0x86   :  { %v70_v38 = vpop.permute.xlu1 %69  ;;  %v63_v39 = vpop.permute.xlu0 %62 }
  0x87   :  { %v119_v40 = vcombine.low %v56_v31, %v70_v38  ;;  %v120_v41 = vcombine.high %v56_v31, %v70_v38  ;;  %v103_v42 = vcombine.low %v49_v32, %v63_v39  ;;  %v104_v43 = vcombine.high %v49_v32, %v63_v39 }
  0x88   :  { %v412_v39 = vmov 683565275  }
  0x89   :  { %v127_v48 = vrot.slane %v119_v40, %v78_v29  ;;  %v134_v49 = vrot.slane %v120_v41, %v78_v29  ;;  %v111_v50 = vrot.slane %v103_v42, %v78_v29  ;;  %v118_v51 = vrot.slane %v104_v43, %v78_v29 }
  0x8a   :  { %v413_v41 = vmov 2475754826  }
  0x8b   :  { %v167_v53 = vcombine.low %v111_v50, %v127_v48  ;;  %v168_v54 = vcombine.high %v111_v50, %v127_v48  ;;  %v183_v55 = vcombine.low %v118_v51, %v134_v49  ;;  %v184_v61 = vcombine.high %v118_v51, %v134_v49 }
  0x8c   :  { %v416_v50 = vmov 920167782  }
  0x8d   :  { %v182_v58 = vrot.slane %v168_v54, %v142_v47  ;;  %v175_v60 = vrot.slane %v167_v53, %v142_v47  ;;  %v191_v0 = vrot.slane %v183_v55, %v142_v47  ;;  %v198_v6 = vrot.slane %v184_v61, %v142_v47 }
  0x8e   :  { %v415_v47 = vmov 2102212464   ;;  %v417_v53 = vmov 1326507024  }
  0x8f   :  { %v201_v62 = vcombine.low %v150_v57, %v182_v58  ;;  %v200_v63 = vcombine.high %v143_v59, %v175_v60  ;;  %v199_v2 = vcombine.low %v143_v59, %v175_v60  ;;  %v203_v4 = vcombine.low %v159_v1, %v191_v0 }
  0x90   :  { %v202_v5 = vcombine.high %v150_v57, %v182_v58  ;;  %v205_v8 = vcombine.low %v166_v7, %v198_v6  ;;  %v204_v9 = vcombine.high %v159_v1, %v191_v0  ;;  %v206_v10 = vcombine.high %v166_v7, %v198_v6 }
  0x91   :  { %212 = vrot.lane.b32.xlu1 %v201_v62, %s405_s0  ;;  %208 = vrot.lane.b32.xlu0 %v200_v63, %s406_s14 }
  0x95   :  { %220 = vrot.lane.b32.xlu1 %v203_v4, %s407_s15  ;;  %216 = vrot.lane.b32.xlu0 %v202_v5, %s408_s16 }
  0x99   :  { %228 = vrot.lane.b32.xlu1 %v205_v8, %s409_s17  ;;  %224 = vrot.lane.b32.xlu0 %v204_v9, %s410_s18 }
  0x9d   :  { %232 = vrot.lane.b32.xlu0 %v206_v10, %s411_s19 }
 0x103   :  { %v213_v11 = vpop.permute.xlu1 %212  ;;  %v209_v12 = vpop.permute.xlu0 %208 }
 0x104   :  { %v236_v13 = vsel %vm235_vm0, %v199_v2, %v209_v12 }
 0x105   :  { %v238_v16 = vsel %vm237_vm1, %v236_v13, %v213_v11 }
 0x107   :  { %v221_v14 = vpop.permute.xlu1 %220  ;;  %v217_v15 = vpop.permute.xlu0 %216 }
 0x108   :  { %v240_v17 = vsel %vm239_vm2, %v238_v16, %v217_v15 }
 0x109   :  { %v242_v19 = vsel %vm241_vm3, %v240_v17, %v221_v14 }
 0x10b   :  { %v225_v18 = vpop.permute.xlu0 %224  ;;  %v229_v20 = vpop.permute.xlu1 %228 }
 0x10c   :  { %v244_v21 = vsel %vm243_vm4, %v242_v19, %v225_v18 }
 0x10d   :  { %v246_v24 = vsel %vm245_vm5, %v244_v21, %v229_v20 }
 0x10f   :  { %v233_v23 = vpop.permute.xlu0 %232 }
 0x110   :  { %v248_v26 = vsel %vm247_vm6, %v246_v24, %v233_v23 }
 0x111   :  { %v256_v27 = vmul.f32 %v374_v22, %v248_v26 }
 0x113   :  { %v447_v28 = vadd.f32 %v375_v25, %v256_v27 }
 0x115   :  { %v268_v29 = vand.u32 2139095040, %v447_v28  ;;  %v265_v33 = vand.u32 2147483647, %v447_v28  ;;  %vm267_vm14 = vcmp.lt.s32.totalorder %v447_v28, 0  ;;  %vm357_vm3 = vweird.f32 %v447_v28 }
 0x117   :  { %v269_v30 = vshrl.u32 %v268_v29, 23  ;;  %v272_v36 = vand.u32 8388607, %v265_v33  ;;  %vm266_vm15 = vcmp.le.f32.partialorder %v265_v33, 0.7853982 }
 0x119   :  { %v376_v31 = vadd.s32 4294967169, %v269_v30  ;;  %v273_v55 = vor.u32 8388608, %v272_v36 }
 0x11b   :  { %v275_v32 = vadd.s32 1, %v376_v31  ;;  %v313_v5 = vshll.u32 %v273_v55, 8 }
 0x11d   :  { %vm276_vm7 = vcmp.gt.s32.totalorder %v275_v32, 0 }
 0x11e   :  { %v277_v34 = vsel %vm276_vm7, %v275_v32, 0 }
 0x11f   :  { %v279_v35 = vand.u32 31, %v277_v34  ;;  %v278_v38 = vshrl.u32 %v277_v34, 5 }
 0x121   :  { %v280_v37 = vsub.s32 32, %v279_v35  ;;  %v282_v40 = vshll.u32 %v412_v39, %v279_v35  ;;  %v285_v42 = vshll.u32 %v413_v41, %v279_v35  ;;  %v288_v46 = vshll.u32 %v414_v44, %v279_v35 }
 0x122   :  { %v291_v49 = vshll.u32 %v415_v47, %v279_v35  ;;  %v294_v52 = vshll.u32 %v416_v50, %v279_v35  ;;  %vm297_vm8 = vcmp.lt.s32.totalorder %v278_v38, 1  ;;  %vm300_vm9 = vcmp.lt.s32.totalorder %v278_v38, 4 }
 0x123   :  { %v283_v43 = vshrl.u32 %v413_v41, %v280_v37  ;;  %v286_v45 = vshrl.u32 %v414_v44, %v280_v37  ;;  %v289_v48 = vshrl.u32 %v415_v47, %v280_v37  ;;  %v292_v51 = vshrl.u32 %v416_v50, %v280_v37 }
 0x124   :  { %v295_v54 = vshrl.u32 %v417_v53, %v280_v37  ;;  %v281_v0 = vshrl.u32 %v412_v39, %v280_v37  ;;  %vm299_vm10 = vcmp.lt.s32.totalorder %v278_v38, 3  ;;  %vm298_vm11 = vcmp.lt.s32.totalorder %v278_v38, 2 }
 0x125   :  { %v284_v56 = vor.u32 %v283_v43, %v282_v40  ;;  %v287_v57 = vor.u32 %v286_v45, %v285_v42  ;;  %v290_v58 = vor.u32 %v289_v48, %v288_v46  ;;  %v293_v59 = vor.u32 %v292_v51, %v291_v49 }
 0x126   :  { %v296_v60 = vor.u32 %v295_v54, %v294_v52 }
 0x127   :  { %v302_v61 = vsel %vm300_vm9, %v290_v58, 2102212464  ;;  %v305_v62 = vsel %vm297_vm8, %v284_v56, %v287_v57  ;;  %v309_v63 = vsel %vm297_vm8, %v287_v57, %v290_v58  ;;  %v306_v2 = vsel %vm300_vm9, %v293_v59, 920167782 }
 0x128   :  { %v310_v3 = vsel %vm300_vm9, %v296_v60, 1326507024  ;;  %v307_v1 = vsel %vm299_vm10, %v290_v58, %v306_v2  ;;  %v301_v6 = vsel %vm297_vm8, %v281_v0, %v284_v56  ;;  %v303_v7 = vsel %vm299_vm10, %v287_v57, %v302_v61 }
 0x129   :  { %v311_v4 = vsel %vm299_vm10, %v293_v59, %v310_v3  ;;  %v308_v8 = vsel %vm298_vm11, %v305_v62, %v307_v1  ;;  %v304_v14 = vsel %vm298_vm11, %v301_v6, %v303_v7 }
 0x12a   :  { %v312_v9 = vsel %vm298_vm11, %v309_v63, %v311_v4  ;;  %v456_v12 = vmul.u32.u64.low %v313_v5, %v308_v8  ;;  %v457_v13 = vmul.u32.u64.high %v313_v5, %v308_v8, %v456_v12  ;;  %v320_v16 = vmul.u32 %v313_v5, %v304_v14 }
 0x12b   :  { %v453_v10 = vmul.u32.u64.low %v313_v5, %v312_v9  ;;  %v454_v11 = vmul.u32.u64.high %v313_v5, %v312_v9, %v453_v10 }
 0x12c   :  { %v323_v15 = vadd.s32 1, %v457_v13 }
 0x12d   :  { %vm322_vm12 = vc.u32 %v454_v11, %v456_v12  ;;  %v321_v29 = vadd.s32 %v456_v12, %v454_v11 }
 0x12e   :  { %v324_v17 = vsel %vm322_vm12, %v323_v15, %v457_v13 }
 0x12f   :  { %v325_v18 = vadd.s32 %v324_v17, %v320_v16 }
 0x131   :  { %v326_v19 = vadd.s32 536870912, %v325_v18 }
 0x133   :  { %v327_v20 = vshrl.u32 %v326_v19, 30 }
 0x135   :  { %v328_v21 = vshll.u32 %v327_v20, 30  ;;  %v351_v42 = vsub.s32 4, %v327_v20 }
 0x137   :  { %v329_v22 = vsub.s32 %v325_v18, %v328_v21  ;;  %v352_v45 = vsel %vm267_vm14, %v351_v42, %v327_v20 }
 0x138   :  { %v354_v47 = vsel %vm266_vm15, 0, %v352_v45 }
 0x139   :  { %v331_v23 = vsub.s32 0, %v329_v22  ;;  %v358_v48 = vadd.s32 3, %v354_v47 }
 0x13b   :  { %v377_v24 = vmin.u32 %v331_v23, %v329_v22  ;;  %v359_v49 = vand.u32 3, %v358_v48 }
 0x13d   :  { %v333_v25 = vclz %v377_v24  ;;  %vm364_vm0 = vcmp.eq.s32.totalorder %v359_v49, 2  ;;  %vm361_vm1 = vcmp.eq.s32.totalorder %v359_v49, 0  ;;  %vm360_vm2 = vcmp.lt.s32.totalorder %v359_v49, 2 }
 0x13f   :  { %v378_v26 = vadd.s32 4294967294, %v333_v25 }
 0x141   :  { %vm379_vm13 = vcmp.lt.s32.totalorder %v378_v26, 0 }
 0x142   :  { %v336_v27 = vsel %vm379_vm13, 0, %v378_v26 }
 0x143   :  { %v337_v30 = vsub.s32 32, %v336_v27  ;;  %v341_v31 = vsub.s32 4294967266, %v336_v27  ;;  %v338_v32 = vshll.u32 %v329_v22, %v336_v27 }
 0x145   :  { %v339_v34 = vshrl.u32 %v321_v29, %v337_v30  ;;  %v342_v35 = vadd.s32 127, %v341_v31 }
 0x147   :  { %v340_v36 = vor.u32 %v339_v34, %v338_v32  ;;  %v343_v37 = vshll.u32 %v342_v35, 23 }
 0x149   :  { %v344_v38 = vor.u32 4788187, %v343_v37  ;;  %v347_v40 = vcvt.s32.f32 %v340_v36 }
 0x14b   :  { %v345_v39 = vand.u32 2147483647, %v344_v38 }
 0x14d   :  { %v348_v41 = vmul.f32 %v347_v40, %v345_v39 }
 0x14f   :  { %v349_v43 = vxor.u32 2147483648, %v348_v41 }
 0x151   :  { %v350_v44 = vsel %vm267_vm14, %v349_v43, %v348_v41 }
 0x152   :  { %v353_v46 = vsel %vm266_vm15, %v447_v28, %v350_v44 }
 0x153   :  { %399 = vcosq.f32 %v353_v46 }
 0x154   :  { %401 = vsinq.f32 %v353_v46 }
 0x15d   :  { %v400_v50 = vpop.eup %399 }
 0x15e   :  { %v402_v51 = vpop.eup %401  ;;  %v365_v52 = vxor.u32 2147483648, %v400_v50 }
 0x15f   :  { %v362_v53 = vxor.u32 2147483648, %v402_v51 }
 0x160   :  { %v366_v54 = vsel %vm364_vm0, %v365_v52, %v402_v51 }
 0x161   :  { %v363_v55 = vsel %vm361_vm1, %v400_v50, %v362_v53 }
 0x162   :  { %v367_v33 = vsel %vm360_vm2, %v363_v55, %v366_v54 }
 0x163   :  { %v368_v56 = vsel %vm357_vm3, nan, %v367_v33 }
 0x164   :  { %369 = vst [vmem:[%s474_s3] sm:$0xff] %v368_v56 }

</bundles_post_ra>
